<compile_context>
chip_gen: v5e
topology: v5e:2x2
jax: 0.10.0
libtpu: 0.0.40
codegen_flags: <defaults>
</compile_context>

<pallas_src>
import numpy as np
import jax
import jax.numpy as jnp
from jax.experimental import pallas as pl
from jax.experimental.pallas import tpu as pltpu

LANE = 128  # pad every feature / weight lane dimension to the vreg lane width

_CP = pltpu.CompilerParams(dimension_semantics=("arbitrary",))


# ----------------------------------------------------------------------------
# Small helpers
# ----------------------------------------------------------------------------
def _fs(a):
    """Full-array VMEM block spec (grid=(1,)) for an array of any rank."""
    nd = a.ndim
    return pl.BlockSpec(a.shape, lambda i, _nd=nd: (0,) * _nd)


def _fs_shape(shape):
    nd = len(shape)
    return pl.BlockSpec(shape, lambda i, _nd=nd: (0,) * _nd)


def pad_feat(x):
    """Zero-pad a dense [M, C] feature block to [M, LANE] f32 (done in XLA once)."""
    m, c = x.shape
    return jnp.zeros((m, LANE), jnp.float32).at[:, :c].set(x.astype(jnp.float32))


def _mxu(a, w):
    # bf16 MXU operands, f32 accumulation (fast path on v6e/v7x, fine on v5e).
    return jnp.dot(a.astype(jnp.bfloat16), w.astype(jnp.bfloat16),
                   preferred_element_type=jnp.float32)


# ----------------------------------------------------------------------------
# Kernel 1: fused dual embedding
#   out = MLP_cat(one_hot(int_cols)) + MLP_dense(x_dense)
#   (one-hot of the concatenated categorical vocab is built in-kernel)
# ----------------------------------------------------------------------------
def _dual_embed_kernel_factory(n_cols, n_a, n_b):
    def kernel(*refs):
        col_refs = refs[:n_cols]                  # each [M, 1] int32 (already offset)
        xb_ref = refs[n_cols]                     # [M, LANE] f32 (padded dense input)
        wa_ref, ba_ref, wb_ref, bb_ref = refs[n_cols + 1:n_cols + 5]
        o_ref = refs[n_cols + 5]

        M = o_ref.shape[0]
        iota = jax.lax.broadcasted_iota(jnp.int32, (M, LANE), 1)
        oh = (iota == col_refs[0][...]).astype(jnp.float32)
        for c in col_refs[1:]:
            oh = oh + (iota == c[...]).astype(jnp.float32)

        def run_mlp(h, w_ref, b_ref, n):
            for i in range(n):
                h = _mxu(h, w_ref[i]) + b_ref[pl.ds(i, 1), :]
                if i < n - 1:
                    h = jnp.maximum(h, 0.0)
            return h

        o_ref[...] = (run_mlp(oh, wa_ref, ba_ref, n_a)
                      + run_mlp(xb_ref[...], wb_ref, bb_ref, n_b))
    return kernel


def dual_embed(int_cols, mlp_cat, x_dense_padded, mlp_dense):
    wa, ba = mlp_cat
    wb, bb = mlp_dense
    M = int_cols[0].shape[0]
    args = [*int_cols, x_dense_padded, wa, ba, wb, bb]
    return pl.pallas_call(
        _dual_embed_kernel_factory(len(int_cols), wa.shape[0], wb.shape[0]),
        out_shape=jax.ShapeDtypeStruct((M, LANE), jnp.float32),
        grid=(1,),
        in_specs=[_fs(a) for a in args],
        out_specs=_fs_shape((M, LANE)),
        compiler_params=_CP,
    )(*args)


# ----------------------------------------------------------------------------
# Kernel 2: RBF expansion fused with its projection Linear
# ----------------------------------------------------------------------------
def _rbf_kernel_factory(gamma):
    def kernel(x_ref, c_ref, w_ref, b_ref, o_ref):
        x = x_ref[...]                                   # [M, 1] f32
        c = c_ref[...]                                   # [1, LANE] padded centers
        rbf = jnp.exp(-gamma * (x - c) ** 2)             # [M, LANE]  (EUP exp)
        o_ref[...] = _mxu(rbf, w_ref[...]) + b_ref[...]  # padded weight rows are zero
    return kernel


def rbf_embedding(x_1d, centers_padded, gamma, w, b):
    M = x_1d.shape[0]
    x2d = x_1d.reshape(M, 1).astype(jnp.float32)
    args = [x2d, centers_padded, w, b]
    return pl.pallas_call(
        _rbf_kernel_factory(float(gamma)),
        out_shape=jax.ShapeDtypeStruct((M, LANE), jnp.float32),
        grid=(1,),
        in_specs=[_fs(a) for a in args],
        out_specs=_fs_shape((M, LANE)),
        compiler_params=_CP,
    )(*args)


# ----------------------------------------------------------------------------
# Kernel 3: fully fused message-passing step
#   angle stage -> bond stage -> atom stage -> global update, all in one call.
#   * gathers via one-hot matmuls (iota == idx) built in-kernel
#   * split-W1 MLPs (no concat), bf16 MXU with f32 accumulation
#   * segment-sum / pooling via one-hot matmuls in f32
#   * residual adds in the epilogue (eval mode: dropout = identity)
# ----------------------------------------------------------------------------
def _mp_block_kernel_factory(n_tail):
    snw = 3 + n_tail            # weights per edge stage
    snb = 1 + n_tail            # biases per edge stage

    def edge_stage(x_node, msg, src_sub, dst_sub, dst_lane, w_ref, b_ref, wo, bo):
        T = x_node.shape[0]
        E = msg.shape[0]
        iota_et = jax.lax.broadcasted_iota(jnp.int32, (E, T), 1)
        g_src = (iota_et == src_sub).astype(jnp.float32)                # [E, T]
        g_dst = (iota_et == dst_sub).astype(jnp.float32)                # [E, T]
        x_src = jnp.dot(g_src, x_node, preferred_element_type=jnp.float32)
        x_dst = jnp.dot(g_dst, x_node, preferred_element_type=jnp.float32)

        h = (_mxu(x_src, w_ref[wo + 0])
             + _mxu(x_dst, w_ref[wo + 1])
             + _mxu(msg, w_ref[wo + 2])
             + b_ref[pl.ds(bo, 1), :])
        h = jnp.maximum(h, 0.0)
        for i in range(n_tail):
            h = _mxu(h, w_ref[wo + 3 + i]) + b_ref[pl.ds(bo + 1 + i, 1), :]
            if i < n_tail - 1:
                h = jnp.maximum(h, 0.0)                  # no ReLU after last layer

        scat = (jax.lax.broadcasted_iota(jnp.int32, (T, E), 0)
                == dst_lane).astype(jnp.float32)         # [T, E]
        return jnp.dot(scat, h, preferred_element_type=jnp.float32)     # [T, LANE]

    def kernel(atom_ref, bond_ref, angle_ref, dih_ref, u_ref,
               ad_src_s, ad_dst_s, ad_dst_l,
               ba_src_s, ba_dst_s, ba_dst_l,
               ab_src_s, ab_dst_s, ab_dst_l,
               atom_b_l, bond_b_l, angle_b_l,
               w_ref, b_ref,
               atom_out, bond_out, angle_out, u_out):
        atom = atom_ref[...]
        bond = bond_ref[...]
        angle = angle_ref[...]
        dih = dih_ref[...]
        u = u_ref[...]

        angle_1 = edge_stage(angle, dih, ad_src_s[...], ad_dst_s[...], ad_dst_l[...],
                             w_ref, b_ref, 0 * snw, 0 * snb)
        bond_1 = edge_stage(bond, angle_1, ba_src_s[...], ba_dst_s[...], ba_dst_l[...],
                            w_ref, b_ref, 1 * snw, 1 * snb)
        atom_1 = edge_stage(atom, bond_1, ab_src_s[...], ab_dst_s[...], ab_dst_l[...],
                            w_ref, b_ref, 2 * snw, 2 * snb)

        # Global update: sum-pool atom_1/bond_1/angle_1 by graph id + 4-way split W1.
        G = u_out.shape[0]

        def pool(x, batch_lane):
            oh = (jax.lax.broadcasted_iota(jnp.int32, (G, x.shape[0]), 0)
                  == batch_lane).astype(jnp.float32)
            return jnp.dot(oh, x, preferred_element_type=jnp.float32)

        gw = 3 * snw
        gb = 3 * snb
        h = (_mxu(pool(atom_1, atom_b_l[...]), w_ref[gw + 0])
             + _mxu(pool(bond_1, bond_b_l[...]), w_ref[gw + 1])
             + _mxu(pool(angle_1, angle_b_l[...]), w_ref[gw + 2])
             + _mxu(u, w_ref[gw + 3])
             + b_ref[pl.ds(gb, 1), :])
        h = jnp.maximum(h, 0.0)
        for i in range(n_tail):
            h = _mxu(h, w_ref[gw + 4 + i]) + b_ref[pl.ds(gb + 1 + i, 1), :]
            if i < n_tail - 1:
                h = jnp.maximum(h, 0.0)

        # Residuals (eval mode: F.dropout(training=False) is the identity).
        atom_out[...] = atom_1 + atom
        bond_out[...] = bond_1 + bond
        angle_out[...] = angle_1 + angle
        u_out[...] = h + u
    return kernel


def mp_block(atom_attr, bond_attr, angle_attr, dihedral_attr, u,
             ad_idx, ba_idx, ab_idx, batches, blk, n_tail, num_graphs):
    NA, NB, NG = atom_attr.shape[0], bond_attr.shape[0], angle_attr.shape[0]
    args = [atom_attr, bond_attr, angle_attr, dihedral_attr, u,
            *ad_idx, *ba_idx, *ab_idx, *batches, blk["W"], blk["B"]]
    out_shape = (jax.ShapeDtypeStruct((NA, LANE), jnp.float32),
                 jax.ShapeDtypeStruct((NB, LANE), jnp.float32),
                 jax.ShapeDtypeStruct((NG, LANE), jnp.float32),
                 jax.ShapeDtypeStruct((num_graphs, LANE), jnp.float32))
    return pl.pallas_call(
        _mp_block_kernel_factory(n_tail),
        out_shape=out_shape,
        grid=(1,),
        in_specs=[_fs(a) for a in args],
        out_specs=tuple(_fs_shape(s.shape) for s in out_shape),
        compiler_params=_CP,
    )(*args)


# ----------------------------------------------------------------------------
# Parameter init (padded / stacked / pre-cast ONCE at init time)
# ----------------------------------------------------------------------------
def init_linear_padded(key, in_dim, out_dim):
    kw, kb = jax.random.split(key)
    w = jax.random.normal(kw, (in_dim, out_dim), jnp.float32) / np.sqrt(in_dim)
    b = 0.01 * jax.random.normal(kb, (out_dim,), jnp.float32)
    wp = jnp.zeros((LANE, LANE), jnp.float32).at[:in_dim, :out_dim].set(w)
    bp = jnp.zeros((LANE,), jnp.float32).at[:out_dim].set(b)
    return wp, bp


def init_mlp_stack(key, in_dim, sizes):
    ws, bs = [], []
    prev = in_dim
    for s in sizes:
        key, k = jax.random.split(key)
        w, b = init_linear_padded(k, prev, s)
        ws.append(w)
        bs.append(b)
        prev = s
    return jnp.stack(ws).astype(jnp.bfloat16), jnp.stack(bs)


def init_block_stacked(key, latent, hidden, n_layers):
    """One MP step: angle/bond/atom edge stages (split W1 into 3) + global (4)."""
    sizes = [hidden] * n_layers + [latent]
    first, tail = sizes[0], sizes[1:]
    ws, bs = [], []

    def add_stage(k, n_split):
        kk = jax.random.split(k, n_split + 1 + len(tail))
        for i in range(n_split):
            w, _ = init_linear_padded(kk[i], latent, first)
            ws.append(w)
        _, b1 = init_linear_padded(kk[n_split], latent, first)
        bs.append(b1)
        prev = first
        for j, s in enumerate(tail):
            w, b = init_linear_padded(kk[n_split + 1 + j], prev, s)
            ws.append(w)
            bs.append(b)
            prev = s

    k1, k2, k3, k4 = jax.random.split(key, 4)
    add_stage(k1, 3)   # angle stage
    add_stage(k2, 3)   # bond stage
    add_stage(k3, 3)   # atom stage
    add_stage(k4, 4)   # global stage
    return {"W": jnp.stack(ws).astype(jnp.bfloat16), "B": jnp.stack(bs)}


def init_model_params(key, cfg):
    latent, hidden, n_layers = cfg["latent"], cfg["hidden"], cfg["n_layers"]
    sizes = [hidden] * n_layers + [latent]
    atom_in = sum(cfg["atom_dims"])
    bond_in = sum(cfg["bond_dims"])
    keys = jax.random.split(key, 10 + cfg["num_mp_steps"])

    angle_centers = np.arange(0.0, np.pi, 0.1).astype(np.float32)        # 32 centers
    dihedral_centers = np.arange(-np.pi, np.pi, 0.2).astype(np.float32)  # 32 centers

    def pad_centers(c):
        return jnp.zeros((1, LANE), jnp.float32).at[0, :c.shape[0]].set(jnp.asarray(c))

    def rbf_linear(k, n_centers):
        w, b = init_linear_padded(k, n_centers, latent)
        return w.astype(jnp.bfloat16), b.reshape(1, LANE)

    g0 = jax.random.normal(keys[4], (1, latent), jnp.float32)
    global_init = jnp.zeros((1, LANE), jnp.float32).at[0, :latent].set(g0[0])

    return {
        "atom_init": init_mlp_stack(keys[0], atom_in, sizes),
        "bond_init": init_mlp_stack(keys[1], bond_in, sizes),
        "pos_embedding": init_mlp_stack(keys[2], 3, [latent, latent]),
        "dis_embedding": init_mlp_stack(keys[3], 1, [latent, latent]),
        "global_init": global_init,
        "angle_centers": pad_centers(angle_centers),
        "angle_linear": rbf_linear(keys[5], angle_centers.shape[0]),
        "dihedral_centers": pad_centers(dihedral_centers),
        "dihedral_linear": rbf_linear(keys[6], dihedral_centers.shape[0]),
        "n_tail": len(sizes) - 1,
        "layers": [init_block_stacked(keys[10 + i], latent, hidden, n_layers)
                   for i in range(cfg["num_mp_steps"])],
    }


# ----------------------------------------------------------------------------
# Model forward
# ----------------------------------------------------------------------------
def prep_edge_idx(edges):
    e = edges.astype(jnp.int32)
    src_sub = e[:, 0:1]                       # [E, 1] for gather one-hot
    dst_sub = e[:, 1:2]                       # [E, 1] for gather one-hot
    dst_lane = dst_sub.reshape(1, -1)         # [1, E] for segment-sum one-hot
    return src_sub, dst_sub, dst_lane


def egeognn_forward(params, cfg, AB_edges, BA_edges, AD_edges, pos, x, bond_feats,
                    bond_lengths, bond_angles, dihedral_angles,
                    num_atoms, num_bonds, num_angles, num_graphs, atom_batch):
    latent = cfg["latent"]

    # Shifted categorical columns (one-hot of the concatenated vocab is built
    # in-kernel from these; no XLA one_hot / concat / pad).
    atom_off = np.concatenate([[0], np.cumsum(cfg["atom_dims"])[:-1]]).astype(np.int32)
    bond_off = np.concatenate([[0], np.cumsum(cfg["bond_dims"])[:-1]]).astype(np.int32)
    atom_cols = [(x[:, i].astype(jnp.int32) + int(atom_off[i])).reshape(-1, 1)
                 for i in range(len(cfg["atom_dims"]))]
    bond_cols = [(bond_feats[:, i].astype(jnp.int32) + int(bond_off[i])).reshape(-1, 1)
                 for i in range(len(cfg["bond_dims"]))]

    graph_idx = np.arange(num_graphs)
    bond_batch = jnp.asarray(np.repeat(graph_idx, np.asarray(num_bonds)), jnp.int32)
    angle_batch = jnp.asarray(np.repeat(graph_idx, np.asarray(num_angles)), jnp.int32)

    # Initial embeddings: atom_init(one_hot(x)) + pos_embedding(pos) fused in ONE
    # kernel (likewise for bonds); RBF + linear fused for angles / dihedrals.
    atom_attr = dual_embed(atom_cols, params["atom_init"],
                           pad_feat(pos), params["pos_embedding"])
    bond_attr = dual_embed(bond_cols, params["bond_init"],
                           pad_feat(bond_lengths.reshape(-1, 1)), params["dis_embedding"])
    angle_attr = rbf_embedding(bond_angles, params["angle_centers"], 10.0,
                               *params["angle_linear"])
    dihedral_attr = rbf_embedding(dihedral_angles, params["dihedral_centers"], 10.0,
                                  *params["dihedral_linear"])
    u = jnp.broadcast_to(params["global_init"], (num_graphs, LANE))

    # Edge / batch index prep hoisted out of the MP loop (constant across layers).
    ad_idx = prep_edge_idx(AD_edges)
    ba_idx = prep_edge_idx(BA_edges)
    ab_idx = prep_edge_idx(AB_edges)
    batches = (jnp.asarray(atom_batch).reshape(1, -1).astype(jnp.int32),
               bond_batch.reshape(1, -1),
               angle_batch.reshape(1, -1))

    n_tail = params["n_tail"]
    for blk in params["layers"]:
        # eval mode: F.dropout(training=False) is the identity; residual adds
        # are applied inside the fused kernel's epilogue.
        atom_attr, bond_attr, angle_attr, u = mp_block(
            atom_attr, bond_attr, angle_attr, dihedral_attr, u,
            ad_idx, ba_idx, ab_idx, batches, blk, n_tail, num_graphs)

    # Strip lane padding once at the very end.
    return (atom_attr[:, :latent], bond_attr[:, :latent], angle_attr[:, :latent],
            dihedral_attr[:, :latent], u[:, :latent])


# ----------------------------------------------------------------------------
# Main
# ----------------------------------------------------------------------------
if __name__ == "__main__":
    cfg = {
        "latent": 32,
        "hidden": 32,
        "n_layers": 2,
        "num_mp_steps": 2,
        "atom_dims": [16, 8, 8],   # get_feature_dims(atom_names), sum = 32
        "bond_dims": [8, 8],       # get_feature_dims(bond_names), sum = 16
    }

    root = jax.random.PRNGKey(0)
    pkey, dkey = jax.random.split(root)
    params = init_model_params(pkey, cfg)

    num_graphs = 2
    num_atoms = np.array([8, 8])    # 16 atoms total
    num_bonds = np.array([8, 8])    # 16 bonds total
    num_angles = np.array([8, 8])   # 16 angles total
    n_dihedrals = 16

    NA, NB, NG = int(num_atoms.sum()), int(num_bonds.sum()), int(num_angles.sum())
    ks = jax.random.split(dkey, 12)

    # per-graph-local edge indices, offset into global index space
    ab0 = jax.random.randint(ks[0], (8, 2), 0, 8)
    ab1 = jax.random.randint(ks[1], (8, 2), 0, 8) + 8
    AtomBondGraph_edges = jnp.concatenate([ab0, ab1], axis=0).astype(jnp.int32)
    ba0 = jax.random.randint(ks[2], (8, 2), 0, 8)
    ba1 = jax.random.randint(ks[3], (8, 2), 0, 8) + 8
    BondAngleGraph_edges = jnp.concatenate([ba0, ba1], axis=0).astype(jnp.int32)
    ad0 = jax.random.randint(ks[4], (8, 2), 0, 8)
    ad1 = jax.random.randint(ks[5], (8, 2), 0, 8) + 8
    AngleDihedralGraph_edges = jnp.concatenate([ad0, ad1], axis=0).astype(jnp.int32)

    pos = jax.random.normal(ks[6], (NA, 3), jnp.float32)
    x_feats = jnp.stack([jax.random.randint(ks[7], (NA,), 0, d)
                         for d in cfg["atom_dims"]], axis=1).astype(jnp.int32)
    bond_feats = jnp.stack([jax.random.randint(ks[8], (NB,), 0, d)
                            for d in cfg["bond_dims"]], axis=1).astype(jnp.int32)
    bond_lengths = jax.random.uniform(ks[9], (NB,), jnp.float32, 0.8, 2.0)
    bond_angles = jax.random.uniform(ks[10], (NG,), jnp.float32, 0.0, np.pi)
    dihedral_angles = jax.random.uniform(ks[11], (n_dihedrals,), jnp.float32,
                                         -np.pi, np.pi)
    atom_batch = jnp.asarray(np.repeat(np.arange(num_graphs), num_atoms), jnp.int32)

    outs = egeognn_forward(params, cfg, AtomBondGraph_edges, BondAngleGraph_edges,
                           AngleDihedralGraph_edges, pos, x_feats, bond_feats,
                           bond_lengths, bond_angles, dihedral_angles,
                           num_atoms, num_bonds, num_angles, num_graphs, atom_batch)

    for o in outs:
        jax.block_until_ready(o)

    atom_attr, bond_attr, angle_attr, dihedral_attr, u = outs
    assert atom_attr.shape == (NA, cfg["latent"])
    assert bond_attr.shape == (NB, cfg["latent"])
    assert angle_attr.shape == (NG, cfg["latent"])
    assert dihedral_attr.shape == (n_dihedrals, cfg["latent"])
    assert u.shape == (num_graphs, cfg["latent"])
    assert all(bool(jnp.all(jnp.isfinite(o))) for o in outs)
    print("KERNEL_OK")
</pallas_src>

<mosaic_0001>
module attributes {stable_mosaic.version = 11 : i64} {
  func.func @kernel(%arg0: i32, %arg1: memref<16x1xi32, #tpu.memory_space<vmem>>, %arg2: memref<16x1xi32, #tpu.memory_space<vmem>>, %arg3: memref<16x1xi32, #tpu.memory_space<vmem>>, %arg4: memref<16x128xf32, #tpu.memory_space<vmem>>, %arg5: memref<3x128x128xbf16, #tpu.memory_space<vmem>>, %arg6: memref<3x128xf32, #tpu.memory_space<vmem>>, %arg7: memref<2x128x128xbf16, #tpu.memory_space<vmem>>, %arg8: memref<2x128xf32, #tpu.memory_space<vmem>>, %arg9: memref<16x128xf32, #tpu.memory_space<vmem>>) attributes {dimension_semantics = [#tpu.dimension_semantics<arbitrary>], iteration_bounds = array<i64: 1>, scalar_prefetch = 0 : i64, scratch_operands = 0 : i64, tpu.core_type = #tpu.core_type<tc>, window_params = [{pipeline_mode = #tpu.pipeline_mode<synchronous>, transform_indices = @transform_0, window_bounds = array<i64: 16, 1>}, {pipeline_mode = #tpu.pipeline_mode<synchronous>, transform_indices = @transform_1, window_bounds = array<i64: 16, 1>}, {pipeline_mode = #tpu.pipeline_mode<synchronous>, transform_indices = @transform_2, window_bounds = array<i64: 16, 1>}, {pipeline_mode = #tpu.pipeline_mode<synchronous>, transform_indices = @transform_3, window_bounds = array<i64: 16, 128>}, {pipeline_mode = #tpu.pipeline_mode<synchronous>, transform_indices = @transform_4, window_bounds = array<i64: 3, 128, 128>}, {pipeline_mode = #tpu.pipeline_mode<synchronous>, transform_indices = @transform_5, window_bounds = array<i64: 3, 128>}, {pipeline_mode = #tpu.pipeline_mode<synchronous>, transform_indices = @transform_6, window_bounds = array<i64: 2, 128, 128>}, {pipeline_mode = #tpu.pipeline_mode<synchronous>, transform_indices = @transform_7, window_bounds = array<i64: 2, 128>}, {pipeline_mode = #tpu.pipeline_mode<synchronous>, transform_indices = @transform_8, window_bounds = array<i64: 16, 128>}]} {
    %0 = tpu.iota {dimensions = array<i32: 1>} : vector<16x128xi32>
    %c0 = arith.constant 0 : index
    %c0_0 = arith.constant 0 : index
    %1 = vector.load %arg1[%c0, %c0_0] : memref<16x1xi32, #tpu.memory_space<vmem>>, vector<16x1xi32>
    %2 = vector.broadcast %1 : vector<16x1xi32> to vector<16x128xi32>
    %3 = arith.cmpi eq, %0, %2 : vector<16x128xi32>
    %4 = arith.extui %3 : vector<16x128xi1> to vector<16x128xi32>
    %5 = arith.sitofp %4 : vector<16x128xi32> to vector<16x128xf32>
    %c0_1 = arith.constant 0 : index
    %c0_2 = arith.constant 0 : index
    %6 = vector.load %arg2[%c0_1, %c0_2] : memref<16x1xi32, #tpu.memory_space<vmem>>, vector<16x1xi32>
    %7 = vector.broadcast %6 : vector<16x1xi32> to vector<16x128xi32>
    %8 = arith.cmpi eq, %0, %7 : vector<16x128xi32>
    %9 = arith.extui %8 : vector<16x128xi1> to vector<16x128xi32>
    %10 = arith.sitofp %9 : vector<16x128xi32> to vector<16x128xf32>
    %11 = arith.addf %5, %10 : vector<16x128xf32>
    %c0_3 = arith.constant 0 : index
    %c0_4 = arith.constant 0 : index
    %12 = vector.load %arg3[%c0_3, %c0_4] : memref<16x1xi32, #tpu.memory_space<vmem>>, vector<16x1xi32>
    %13 = vector.broadcast %12 : vector<16x1xi32> to vector<16x128xi32>
    %14 = arith.cmpi eq, %0, %13 : vector<16x128xi32>
    %15 = arith.extui %14 : vector<16x128xi1> to vector<16x128xi32>
    %16 = arith.sitofp %15 : vector<16x128xi32> to vector<16x128xf32>
    %17 = arith.addf %11, %16 : vector<16x128xf32>
    %c0_5 = arith.constant 0 : index
    %c0_6 = arith.constant 0 : index
    %c0_7 = arith.constant 0 : index
    %18 = vector.load %arg5[%c0_5, %c0_6, %c0_7] : memref<3x128x128xbf16, #tpu.memory_space<vmem>>, vector<1x128x128xbf16>
    %19 = vector.shape_cast %18 : vector<1x128x128xbf16> to vector<128x128xbf16>
    %20 = arith.truncf %17 : vector<16x128xf32> to vector<16x128xbf16>
    %cst = arith.constant dense<0.000000e+00> : vector<16x128xf32>
    %21 = tpu.matmul %20, %19, %cst {dimension_numbers = #tpu.dot_dimension_numbers<[1], [0], [0], [1], [0, 0, 1, 1], [], []>} : vector<16x128xbf16>, vector<128x128xbf16>, vector<16x128xf32> -> vector<16x128xf32>
    %c0_8 = arith.constant 0 : index
    %c0_9 = arith.constant 0 : index
    %22 = vector.load %arg6[%c0_8, %c0_9] : memref<3x128xf32, #tpu.memory_space<vmem>>, vector<1x128xf32>
    %23 = vector.broadcast %22 : vector<1x128xf32> to vector<16x128xf32>
    %24 = arith.addf %21, %23 : vector<16x128xf32>
    %cst_10 = arith.constant 0.000000e+00 : f32
    %25 = vector.broadcast %cst_10 : f32 to vector<16x128xf32>
    %26 = arith.maximumf %24, %25 : vector<16x128xf32>
    %c1 = arith.constant 1 : index
    %c0_11 = arith.constant 0 : index
    %c0_12 = arith.constant 0 : index
    %27 = vector.load %arg5[%c1, %c0_11, %c0_12] : memref<3x128x128xbf16, #tpu.memory_space<vmem>>, vector<1x128x128xbf16>
    %28 = vector.shape_cast %27 : vector<1x128x128xbf16> to vector<128x128xbf16>
    %29 = arith.truncf %26 : vector<16x128xf32> to vector<16x128xbf16>
    %cst_13 = arith.constant dense<0.000000e+00> : vector<16x128xf32>
    %30 = tpu.matmul %29, %28, %cst_13 {dimension_numbers = #tpu.dot_dimension_numbers<[1], [0], [0], [1], [0, 0, 1, 1], [], []>} : vector<16x128xbf16>, vector<128x128xbf16>, vector<16x128xf32> -> vector<16x128xf32>
    %c1_14 = arith.constant 1 : index
    %c0_15 = arith.constant 0 : index
    %31 = vector.load %arg6[%c1_14, %c0_15] : memref<3x128xf32, #tpu.memory_space<vmem>>, vector<1x128xf32>
    %32 = vector.broadcast %31 : vector<1x128xf32> to vector<16x128xf32>
    %33 = arith.addf %30, %32 : vector<16x128xf32>
    %cst_16 = arith.constant 0.000000e+00 : f32
    %34 = vector.broadcast %cst_16 : f32 to vector<16x128xf32>
    %35 = arith.maximumf %33, %34 : vector<16x128xf32>
    %c2 = arith.constant 2 : index
    %c0_17 = arith.constant 0 : index
    %c0_18 = arith.constant 0 : index
    %36 = vector.load %arg5[%c2, %c0_17, %c0_18] : memref<3x128x128xbf16, #tpu.memory_space<vmem>>, vector<1x128x128xbf16>
    %37 = vector.shape_cast %36 : vector<1x128x128xbf16> to vector<128x128xbf16>
    %38 = arith.truncf %35 : vector<16x128xf32> to vector<16x128xbf16>
    %cst_19 = arith.constant dense<0.000000e+00> : vector<16x128xf32>
    %39 = tpu.matmul %38, %37, %cst_19 {dimension_numbers = #tpu.dot_dimension_numbers<[1], [0], [0], [1], [0, 0, 1, 1], [], []>} : vector<16x128xbf16>, vector<128x128xbf16>, vector<16x128xf32> -> vector<16x128xf32>
    %c2_20 = arith.constant 2 : index
    %c0_21 = arith.constant 0 : index
    %40 = vector.load %arg6[%c2_20, %c0_21] : memref<3x128xf32, #tpu.memory_space<vmem>>, vector<1x128xf32>
    %41 = vector.broadcast %40 : vector<1x128xf32> to vector<16x128xf32>
    %42 = arith.addf %39, %41 : vector<16x128xf32>
    %c0_22 = arith.constant 0 : index
    %c0_23 = arith.constant 0 : index
    %43 = vector.load %arg4[%c0_22, %c0_23] : memref<16x128xf32, #tpu.memory_space<vmem>>, vector<16x128xf32>
    %c0_24 = arith.constant 0 : index
    %c0_25 = arith.constant 0 : index
    %c0_26 = arith.constant 0 : index
    %44 = vector.load %arg7[%c0_24, %c0_25, %c0_26] : memref<2x128x128xbf16, #tpu.memory_space<vmem>>, vector<1x128x128xbf16>
    %45 = vector.shape_cast %44 : vector<1x128x128xbf16> to vector<128x128xbf16>
    %46 = arith.truncf %43 : vector<16x128xf32> to vector<16x128xbf16>
    %cst_27 = arith.constant dense<0.000000e+00> : vector<16x128xf32>
    %47 = tpu.matmul %46, %45, %cst_27 {dimension_numbers = #tpu.dot_dimension_numbers<[1], [0], [0], [1], [0, 0, 1, 1], [], []>} : vector<16x128xbf16>, vector<128x128xbf16>, vector<16x128xf32> -> vector<16x128xf32>
    %c0_28 = arith.constant 0 : index
    %c0_29 = arith.constant 0 : index
    %48 = vector.load %arg8[%c0_28, %c0_29] : memref<2x128xf32, #tpu.memory_space<vmem>>, vector<1x128xf32>
    %49 = vector.broadcast %48 : vector<1x128xf32> to vector<16x128xf32>
    %50 = arith.addf %47, %49 : vector<16x128xf32>
    %cst_30 = arith.constant 0.000000e+00 : f32
    %51 = vector.broadcast %cst_30 : f32 to vector<16x128xf32>
    %52 = arith.maximumf %50, %51 : vector<16x128xf32>
    %c1_31 = arith.constant 1 : index
    %c0_32 = arith.constant 0 : index
    %c0_33 = arith.constant 0 : index
    %53 = vector.load %arg7[%c1_31, %c0_32, %c0_33] : memref<2x128x128xbf16, #tpu.memory_space<vmem>>, vector<1x128x128xbf16>
    %54 = vector.shape_cast %53 : vector<1x128x128xbf16> to vector<128x128xbf16>
    %55 = arith.truncf %52 : vector<16x128xf32> to vector<16x128xbf16>
    %cst_34 = arith.constant dense<0.000000e+00> : vector<16x128xf32>
    %56 = tpu.matmul %55, %54, %cst_34 {dimension_numbers = #tpu.dot_dimension_numbers<[1], [0], [0], [1], [0, 0, 1, 1], [], []>} : vector<16x128xbf16>, vector<128x128xbf16>, vector<16x128xf32> -> vector<16x128xf32>
    %c1_35 = arith.constant 1 : index
    %c0_36 = arith.constant 0 : index
    %57 = vector.load %arg8[%c1_35, %c0_36] : memref<2x128xf32, #tpu.memory_space<vmem>>, vector<1x128xf32>
    %58 = vector.broadcast %57 : vector<1x128xf32> to vector<16x128xf32>
    %59 = arith.addf %56, %58 : vector<16x128xf32>
    %60 = arith.addf %42, %59 : vector<16x128xf32>
    %c0_37 = arith.constant 0 : index
    %c0_38 = arith.constant 0 : index
    %61 = vector.load %arg9[%c0_37, %c0_38] : memref<16x128xf32, #tpu.memory_space<vmem>>, vector<16x128xf32>
    tpu.vector_store %arg9[%c0_37, %c0_38], %60 {strides = array<i32>} : memref<16x128xf32, #tpu.memory_space<vmem>>, vector<16x128xf32>,
    return
  }
  func.func @transform_0(%arg0: i32) -> (i32, i32) {
    %c0_i32 = arith.constant 0 : i32
    %c0_i32_0 = arith.constant 0 : i32
    %c0_i32_1 = arith.constant 0 : i32
    return %c0_i32, %c0_i32_0 : i32, i32
  }
  func.func @transform_1(%arg0: i32) -> (i32, i32) {
    %c0_i32 = arith.constant 0 : i32
    %c0_i32_0 = arith.constant 0 : i32
    %c0_i32_1 = arith.constant 0 : i32
    return %c0_i32, %c0_i32_0 : i32, i32
  }
  func.func @transform_2(%arg0: i32) -> (i32, i32) {
    %c0_i32 = arith.constant 0 : i32
    %c0_i32_0 = arith.constant 0 : i32
    %c0_i32_1 = arith.constant 0 : i32
    return %c0_i32, %c0_i32_0 : i32, i32
  }
  func.func @transform_3(%arg0: i32) -> (i32, i32) {
    %c0_i32 = arith.constant 0 : i32
    %c0_i32_0 = arith.constant 0 : i32
    %c0_i32_1 = arith.constant 0 : i32
    return %c0_i32, %c0_i32_0 : i32, i32
  }
  func.func @transform_4(%arg0: i32) -> (i32, i32, i32) {
    %c0_i32 = arith.constant 0 : i32
    %c0_i32_0 = arith.constant 0 : i32
    %c0_i32_1 = arith.constant 0 : i32
    %c0_i32_2 = arith.constant 0 : i32
    return %c0_i32, %c0_i32_0, %c0_i32_1 : i32, i32, i32
  }
  func.func @transform_5(%arg0: i32) -> (i32, i32) {
    %c0_i32 = arith.constant 0 : i32
    %c0_i32_0 = arith.constant 0 : i32
    %c0_i32_1 = arith.constant 0 : i32
    return %c0_i32, %c0_i32_0 : i32, i32
  }
  func.func @transform_6(%arg0: i32) -> (i32, i32, i32) {
    %c0_i32 = arith.constant 0 : i32
    %c0_i32_0 = arith.constant 0 : i32
    %c0_i32_1 = arith.constant 0 : i32
    %c0_i32_2 = arith.constant 0 : i32
    return %c0_i32, %c0_i32_0, %c0_i32_1 : i32, i32, i32
  }
  func.func @transform_7(%arg0: i32) -> (i32, i32) {
    %c0_i32 = arith.constant 0 : i32
    %c0_i32_0 = arith.constant 0 : i32
    %c0_i32_1 = arith.constant 0 : i32
    return %c0_i32, %c0_i32_0 : i32, i32
  }
  func.func @transform_8(%arg0: i32) -> (i32, i32) {
    %c0_i32 = arith.constant 0 : i32
    %c0_i32_0 = arith.constant 0 : i32
    %c0_i32_1 = arith.constant 0 : i32
    return %c0_i32, %c0_i32_0 : i32, i32
  }
}

</mosaic_0001>

<bundles_post_ra>
// kernel: tpu_custom_call.1
= control target key start
LH: loop header
LB: loop body
LE: loop exit
PB: predicated region body
PF: predicated region fallthrough
CT: control target
= control target key end

     0   :  { %13 = vsyncpa [#allocation3], 0  ;;  %s953_s0 = inlined_call_operand.vmem [shape: s32[16,1], index: 0, kind: input, shape index: {}]   ;;  %s954_s1 = inlined_call_operand.vmem [shape: s32[16,1], index: 1, kind: input, shape index: {}]   ;;  %s955_s2 = inlined_call_operand.vmem [shape: s32[16,1], index: 2, kind: input, shape index: {}]   ;;  %s956_s3 = inlined_call_operand.vmem [shape: f32[16,128], index: 3, kind: input, shape index: {}]   ;;  %s957_s4 = inlined_call_operand.hbm [shape: bf16[3,128,128], index: 4, kind: input, shape index: {}]   ;;  %s958_s5 = inlined_call_operand.vmem [shape: f32[3,128], index: 5, kind: input, shape index: {}]   ;;  %s959_s6 = inlined_call_operand.hbm [shape: bf16[2,128,128], index: 6, kind: input, shape index: {}]   ;;  %s960_s7 = inlined_call_operand.vmem [shape: f32[2,128], index: 7, kind: input, shape index: {}]   ;;  %s961_s8 = inlined_call_operand.hbm [shape: f32[16,128], index: 8, kind: output, shape index: {}]  }
   0x1   :  { %14 = vsyncpa [#allocation6], 0 }
   0x2   :  { %15 = vsyncpa [#allocation4], 0  ;;  %s28_s29 = sshll.u32 %s957_s4, 4  ;;  %s851_s30 = smov [#allocation2]   ;;  %s29_s29 = int_to_ptr.hbm [resolvable:$true] %s28_s29 }
   0x3   :  { %s30_s9 = sshll.u32 %s851_s30, 4  ;;  %s43_s12 = sshll.u32 %s959_s6, 4  ;;  %s31_s9 = int_to_ptr.vmem [resolvable:$true] %s30_s9  ;;  %s44_s12 = int_to_ptr.hbm [resolvable:$true] %s43_s12 }
   0x4   :  { %s852_s13 = smov 64   ;;  %s853_s14 = smov 4  }
   0x5   :  { %36 = dma.hbm_to_vmem [thread:$0]  %s29_s29, 3072, %s31_s9, [#allocation3], %s852_s13, %s852_s13, %s853_s14  }
   0x6   :  { %s854_s15 = smov [#allocation5]  }
   0x7   :  { %s45_s16 = sshll.u32 %s854_s15, 4  ;;  %s46_s16 = int_to_ptr.vmem [resolvable:$true] %s45_s16 }
   0x8   :  { %51 = dma.hbm_to_vmem [thread:$0]  %s44_s12, 2048, %s46_s16, [#allocation6], %s852_s13, %s852_s13, %s853_s14  }
   0x9   :  { %845 = dma.done.wait [#allocation3], 3072  }
   0xa   :  { %846 = vsyncadd [#allocation3], 4294964224 }
   0xb   :  { %847 = dma.done.wait [#allocation6], 2048  }
   0xc   :  { %848 = vsyncadd [#allocation6], 4294965248  ;;  %v855_v0 = vmov 0   ;;  %v78_v1 = vld [vmem:[%s954_s1] sm:$0xff]  ;;  %v723_v4 = vld [vmem:[#allocation2 + $0x38] sm:$0xff]  ;;  %v62_v21 = vlaneseq  ;;  %v856_v30 = vmov 0.0  }
   0xd   :  { %766 = vset.pattern.permute.xlu1 %v855_v0  ;;  %765 = vset.pattern.permute.xlu0 %v855_v0  ;;  %v64_v2 = vld [vmem:[%s953_s0] sm:$0xff]  ;;  %v722_v5 = vld [vmem:[#allocation2 + $0x30] sm:$0xff]  ;;  %v79_v6 = vld [vmem:[%s954_s1 + $0x8] sm:$0xff]  ;;  %s857_s15 = smov [#allocation7]   ;;  %s536_s6 = sshll.u32 %s961_s8, 4  ;;  %s537_s6 = int_to_ptr.hbm [resolvable:$true] %s536_s6 }
   0xe   :  { %767 = vset.pattern.permute.xlu2 %v855_v0  ;;  %81 = vperm.xlu1 %766, %v78_v1   ;;  %v94_v3 = vld [vmem:[%s955_s2] sm:$0xff]  ;;  %v65_v7 = vld [vmem:[%s953_s0 + $0x8] sm:$0xff]  ;;  %v719_v11 = vld [vmem:[#allocation2 + $0x18] sm:$0xff]  ;;  %v63_v25 = vand.u32 127, %v62_v21  ;;  %s534_s16 = sshll.u32 %s857_s15, 4  ;;  %s535_s16 = int_to_ptr.vmem [resolvable:$true] %s534_s16 }
   0xf   :  { %67 = vperm.xlu0 %765, %v64_v2   ;;  %97 = vperm.xlu2 %767, %v94_v3   ;;  %v95_v8 = vld [vmem:[%s955_s2 + $0x8] sm:$0xff]  ;;  %v720_v10 = vld [vmem:[#allocation2 + $0x20] sm:$0xff]  ;;  %v718_v12 = vld [vmem:[#allocation2 + $0x10] sm:$0xff] }
  0x10   :  { %177 = vmatpush.bf16.msra.mxu0 %v723_v4  ;;  %v721_v9 = vld [vmem:[#allocation2 + $0x28] sm:$0xff]  ;;  %v716_v14 = vld [vmem:[#allocation2] sm:$0xff]  ;;  %v747_v15 = vld [vmem:[#allocation5 + $0x38] sm:$0xff] }
  0x11   :  { %v717_v13 = vld [vmem:[#allocation2 + $0x8] sm:$0xff]  ;;  %v731_v16 = vld [vmem:[#allocation2 + $0x78] sm:$0xff]  ;;  %428 = vmatpush.bf16.msra.mxu3 %v747_v15  ;;  %v746_v17 = vld [vmem:[#allocation5 + $0x30] sm:$0xff] }
  0x12   :  { %261 = vmatpush.bf16.msra.mxu1 %v731_v16  ;;  %v730_v18 = vld [vmem:[#allocation2 + $0x70] sm:$0xff]  ;;  %v745_v19 = vld [vmem:[#allocation5 + $0x28] sm:$0xff]  ;;  %v744_v22 = vld [vmem:[#allocation5 + $0x20] sm:$0xff] }
  0x13   :  { %v729_v20 = vld [vmem:[#allocation2 + $0x68] sm:$0xff]  ;;  %v728_v24 = vld [vmem:[#allocation2 + $0x60] sm:$0xff]  ;;  %v743_v26 = vld [vmem:[#allocation5 + $0x18] sm:$0xff] }
  0x14   :  { %178 = vmatpush.bf16.msra.mxu0 %v722_v5  ;;  %v742_v29 = vld [vmem:[#allocation5 + $0x10] sm:$0xff]  ;;  %v741_v34 = vld [vmem:[#allocation5 + $0x8] sm:$0xff]  ;;  %v740_v42 = vld [vmem:[#allocation5] sm:$0xff] }
  0x15   :  { %429 = vmatpush.bf16.msra.mxu3 %v746_v17  ;;  %v359_v43 = vld [vmem:[%s956_s3] sm:$0xff]  ;;  %v360_v44 = vld [vmem:[%s956_s3 + $0x8] sm:$0xff]  ;;  %v727_v50 = vld [vmem:[#allocation2 + $0x58] sm:$0xff] }
  0x16   :  { %84 = vperm.xlu1 %766, %v79_v6   ;;  %262 = vmatpush.bf16.msra.mxu1 %v730_v18  ;;  %v377_v48 = vpack.c.bf16 %v360_v44, %v359_v43  ;;  %v726_v51 = vld [vmem:[#allocation2 + $0x50] sm:$0xff]  ;;  %v725_v52 = vld [vmem:[#allocation2 + $0x48] sm:$0xff]  ;;  %v724_v53 = vld [vmem:[#allocation2 + $0x40] sm:$0xff] }
  0x17   :  { %70 = vperm.xlu0 %765, %v65_v7   ;;  %100 = vperm.xlu2 %767, %v95_v8   ;;  %v755_v54 = vld [vmem:[#allocation5 + $0x78] sm:$0xff]  ;;  %v754_v56 = vld [vmem:[#allocation5 + $0x70] sm:$0xff]  ;;  %v753_v58 = vld [vmem:[#allocation5 + $0x68] sm:$0xff] }
  0x18   :  { %179 = vmatpush.bf16.msra.mxu0 %v721_v9  ;;  %v739_v55 = vld [vmem:[#allocation2 + $0xb8] sm:$0xff]  ;;  %v738_v57 = vld [vmem:[#allocation2 + $0xb0] sm:$0xff]  ;;  %v737_v59 = vld [vmem:[#allocation2 + $0xa8] sm:$0xff] }
  0x19   :  { %430 = vmatpush.bf16.msra.mxu3 %v745_v19  ;;  %345 = vmatpush.bf16.msra.mxu2 %v739_v55  ;;  %v752_v60 = vld [vmem:[#allocation5 + $0x60] sm:$0xff]  ;;  %v751_v62 = vld [vmem:[#allocation5 + $0x58] sm:$0xff]  ;;  %v750_v0 = vld [vmem:[#allocation5 + $0x50] sm:$0xff] }
  0x1a   :  { %263 = vmatpush.bf16.msra.mxu1 %v729_v20  ;;  %v736_v61 = vld [vmem:[#allocation2 + $0xa0] sm:$0xff]  ;;  %v749_v2 = vld [vmem:[#allocation5 + $0x48] sm:$0xff]  ;;  %v735_v16 = vld [vmem:[#allocation2 + $0x98] sm:$0xff] }
  0x1b   :  { %v768_v1 = vld [vmem:[%s958_s5] ss:$0 sm:$0xff]  ;;  %v734_v19 = vld [vmem:[#allocation2 + $0x90] sm:$0xff]  ;;  %v733_v20 = vld [vmem:[#allocation2 + $0x88] sm:$0xff] }
  0x1c   :  { %180 = vmatpush.bf16.msra.mxu0 %v720_v10  ;;  %v769_v10 = vld [vmem:[%s960_s7] ss:$0 sm:$0xff] }
  0x1d   :  { %431 = vmatpush.bf16.msra.mxu3 %v744_v22  ;;  %346 = vmatpush.bf16.msra.mxu2 %v738_v57  ;;  %v748_v17 = vld [vmem:[#allocation5 + $0x40] sm:$0xff] }
  0x1e   :  { %264 = vmatpush.bf16.msra.mxu1 %v728_v24  ;;  %v732_v21 = vld [vmem:[#allocation2 + $0x80] sm:$0xff] }
  0x20   :  { %181 = vmatpush.bf16.msra.mxu0 %v719_v11 }
  0x21   :  { %432 = vmatpush.bf16.msra.mxu3 %v743_v26  ;;  %347 = vmatpush.bf16.msra.mxu2 %v737_v59 }
  0x22   :  { %265 = vmatpush.bf16.msra.mxu1 %v727_v50 }
  0x24   :  { %182 = vmatpush.bf16.msra.mxu0 %v718_v12 }
  0x25   :  { %433 = vmatpush.bf16.msra.mxu3 %v742_v29  ;;  %348 = vmatpush.bf16.msra.mxu2 %v736_v61 }
  0x26   :  { %266 = vmatpush.bf16.msra.mxu1 %v726_v51 }
  0x28   :  { %183 = vmatpush.bf16.msra.mxu0 %v717_v13 }
  0x29   :  { %434 = vmatpush.bf16.msra.mxu3 %v741_v34  ;;  %349 = vmatpush.bf16.msra.mxu2 %v735_v16 }
  0x2a   :  { %267 = vmatpush.bf16.msra.mxu1 %v725_v52 }
  0x2c   :  { %184 = vmatpush.bf16.msra.mxu0 %v716_v14 }
  0x2d   :  { %435 = vmatpush.bf16.msra.mxu3 %v740_v42  ;;  %350 = vmatpush.bf16.msra.mxu2 %v734_v19 }
  0x2e   :  { %268 = vmatpush.bf16.msra.mxu1 %v724_v53 }
  0x30   :  { %436 = vmatmul.bf16.vlgmr.msra.gmra.mxu3 %v377_v48  ;;  %512 = vmatpush.bf16.msrb.mxu0 %v755_v54 }
  0x31   :  { %351 = vmatpush.bf16.msra.mxu2 %v733_v20 }
  0x34   :  { %513 = vmatpush.bf16.msrb.mxu0 %v754_v56 }
  0x35   :  { %352 = vmatpush.bf16.msra.mxu2 %v732_v21 }
  0x38   :  { %514 = vmatpush.bf16.msrb.mxu0 %v753_v58 }
  0x3c   :  { %515 = vmatpush.bf16.msrb.mxu0 %v752_v60 }
  0x40   :  { %516 = vmatpush.bf16.msrb.mxu0 %v751_v62 }
  0x44   :  { %517 = vmatpush.bf16.msrb.mxu0 %v750_v0 }
  0x48   :  { %518 = vmatpush.bf16.msrb.mxu0 %v749_v2 }
  0x4c   :  { %519 = vmatpush.bf16.msrb.mxu0 %v748_v17 }
  0x69   :  { %v98_v23 = vpop.permute.xlu2 %97 }
  0x6a   :  { %vm102_vm2 = vcmp.eq.s32.totalorder %v63_v25, %v98_v23  ;;  %v770_v23 = vld [vmem:[%s958_s5 + $0x1] ss:$0 sm:$0xff] }
  0x6b   :  { %v554_v38 = vsel %vm102_vm2, 1.0, %v856_v30 }
  0x71   :  { %v101_v33 = vpop.permute.xlu2 %100 }
  0x72   :  { %vm103_vm3 = vcmp.eq.s32.totalorder %v63_v25, %v101_v33 }
  0x73   :  { %v555_v45 = vsel %vm103_vm3, 1.0, %v856_v30 }
  0x80   :  { %v82_v27 = vpop.permute.xlu1 %81 }
  0x81   :  { %v68_v28 = vpop.permute.xlu0 %67  ;;  %vm86_vm0 = vcmp.eq.s32.totalorder %v63_v25, %v82_v27 }
  0x82   :  { %vm72_vm1 = vcmp.eq.s32.totalorder %v63_v25, %v68_v28  ;;  %v552_v31 = vsel %vm86_vm0, 1.0, %v856_v30 }
  0x83   :  { %v550_v32 = vsel %vm72_vm1, 1.0, %v856_v30 }
  0x84   :  { %v92_v37 = vadd.f32 %v552_v31, %v550_v32  ;;  %v771_v31 = vld [vmem:[%s960_s7 + $0x1] ss:$0 sm:$0xff]  ;;  %v772_v32 = vld [vmem:[%s958_s5 + $0x2] ss:$0 sm:$0xff]  ;;  %s858_s5 = smov 128   ;;  %s859_s7 = smov 8  }
  0x86   :  { %v108_v46 = vadd.f32 %v554_v38, %v92_v37 }
  0x88   :  { %v85_v35 = vpop.permute.xlu1 %84 }
  0x89   :  { %v71_v36 = vpop.permute.xlu0 %70  ;;  %vm87_vm4 = vcmp.eq.s32.totalorder %v63_v25, %v85_v35 }
  0x8a   :  { %vm73_vm5 = vcmp.eq.s32.totalorder %v63_v25, %v71_v36  ;;  %v553_v39 = vsel %vm87_vm4, 1.0, %v856_v30 }
  0x8b   :  { %v551_v40 = vsel %vm73_vm5, 1.0, %v856_v30 }
  0x8c   :  { %v93_v41 = vadd.f32 %v553_v39, %v551_v40 }
  0x8e   :  { %v109_v47 = vadd.f32 %v555_v45, %v93_v41 }
  0x90   :  { %v126_v49 = vpack.c.bf16 %v109_v47, %v108_v46 }
  0x92   :  { %185 = vmatmul.bf16.vlgmr.msra.gmra.mxu0 %v126_v49 }
  0xb3   :  { %v437_v9 = vpop.f32.mrf.mxu3 }
  0xb4   :  { %v438_v12 = vadd.f32 %v769_v10, %v437_v9 }
  0xb6   :  { %v442_v14 = vmax.f32 %v438_v12, 0.0 }
  0xbb   :  { %v439_v11 = vpop.f32.mrf.mxu3 }
  0xbc   :  { %v440_v13 = vadd.f32 %v769_v10, %v439_v11 }
  0xbe   :  { %v443_v15 = vmax.f32 %v440_v13, 0.0 }
  0xc0   :  { %v461_v18 = vpack.c.bf16 %v443_v15, %v442_v14 }
  0xc2   :  { %520 = vmatmul.bf16.vlgmr.msrb.gmra.mxu0 %v461_v18 }
 0x10f   :  { %v186_v63 = vpop.f32.mrf.mxu0 }
 0x110   :  { %v187_v3 = vadd.f32 %v768_v1, %v186_v63 }
 0x112   :  { %v191_v6 = vmax.f32 %v187_v3, 0.0 }
 0x117   :  { %v188_v4 = vpop.f32.mrf.mxu0 }
 0x118   :  { %v189_v5 = vadd.f32 %v768_v1, %v188_v4 }
 0x11a   :  { %v192_v7 = vmax.f32 %v189_v5, 0.0 }
 0x11c   :  { %v210_v8 = vpack.c.bf16 %v192_v7, %v191_v6 }
 0x11e   :  { %269 = vmatmul.bf16.vlgmr.msra.gmra.mxu1 %v210_v8 }
 0x13f   :  { %v521_v30 = vpop.f32.mrf.mxu0 }
 0x140   :  { %v522_v34 = vadd.f32 %v771_v31, %v521_v30 }
 0x147   :  { %v523_v37 = vpop.f32.mrf.mxu0 }
 0x148   :  { %v524_v39 = vadd.f32 %v771_v31, %v523_v37 }
 0x19b   :  { %v270_v22 = vpop.f32.mrf.mxu1 }
 0x19c   :  { %v271_v24 = vadd.f32 %v770_v23, %v270_v22 }
 0x19e   :  { %v275_v27 = vmax.f32 %v271_v24, 0.0 }
 0x1a3   :  { %v272_v25 = vpop.f32.mrf.mxu1 }
 0x1a4   :  { %v273_v26 = vadd.f32 %v770_v23, %v272_v25 }
 0x1a6   :  { %v276_v28 = vmax.f32 %v273_v26, 0.0 }
 0x1a8   :  { %v294_v29 = vpack.c.bf16 %v276_v28, %v275_v27 }
 0x1aa   :  { %353 = vmatmul.bf16.vlgmr.msra.gmra.mxu2 %v294_v29 }
 0x22d   :  { %v354_v33 = vpop.f32.mrf.mxu2 }
 0x22e   :  { %v355_v35 = vadd.f32 %v772_v32, %v354_v33 }
 0x230   :  { %v526_v36 = vadd.f32 %v522_v34, %v355_v35 }
 0x232   :  { %528 = vst [vmem:[#allocation7] sm:$0xff] %v526_v36 }
 0x235   :  { %v356_v38 = vpop.f32.mrf.mxu2 }
 0x236   :  { %v357_v40 = vadd.f32 %v772_v32, %v356_v38 }
 0x238   :  { %v527_v41 = vadd.f32 %v524_v39, %v357_v40 }
 0x23a   :  { %529 = vst [vmem:[#allocation7 + $0x8] sm:$0xff] %v527_v41 }
 0x23b   :  { %542 = dma.vmem_to_hbm [thread:$0]  %s535_s16, 256, %s537_s6, [#allocation4], %s858_s5, %s858_s5, %s859_s7  }
 0x23c   :  { %849 = dma.done.wait [#allocation4], 256  }
 0x23d   :  { %850 = vsyncadd [#allocation4], 4294967040 }
 0x23e   :  { %547 = vsyncpa [#allocation3], 1 }
 0x23f   :  { %548 = vsyncpa [#allocation6], 1 }
 0x240   :  { %549 = vsyncpa [#allocation4], 1 }

</bundles_post_ra>
